<compile_context>
chip_gen: v7x
topology: tpu7x:2x2x1
jax: 0.10.0
libtpu: 0.0.40
codegen_flags: <defaults>
</compile_context>

<pallas_src>
import math

import jax
import jax.numpy as jnp
from jax.experimental import pallas as pl
from jax.experimental.pallas import tpu as pltpu


# ----------------------------------------------------------------------------
# Fused SimpleAttention kernel (one batch tile per grid step)
# ----------------------------------------------------------------------------
def _simple_attention_kernel(m_ref, w_ref, pool_ref, alpha_ref):
    m = m_ref[...]                                    # (S, TB, D) fp32
    w = w_ref[...]                                    # (1, D)     fp32

    # scale[s, b] = <M[s, b, :], w>  (lane reduction over D; keepdims so it
    # broadcasts back against m without any relayout)
    scores = jnp.sum(m * w, axis=-1, keepdims=True)              # (S, TB, 1)

    # numerically stable softmax over the sequence axis (torch dim=0)
    mx = jnp.max(scores, axis=0, keepdims=True)                  # (1, TB, 1)
    e = jnp.exp(scores - mx)                                     # (S, TB, 1)
    denom = jnp.sum(e, axis=0, keepdims=True)                    # (1, TB, 1)
    alpha = e * pl.reciprocal(denom, approx=False)               # (S, TB, 1)

    # attn_pool[b, :] = sum_s alpha[s, b] * M[s, b, :]
    pool_ref[...] = jnp.sum(alpha * m, axis=0)                   # (TB, D)

    # lane-dense alpha in its final (B, 1, S) layout: (S, TB, 1) -> (TB, S)
    alpha_bs = jnp.sum(alpha, axis=-1).T                         # (TB, S)
    alpha_ref[:, 0, :] = alpha_bs


def _pick_batch_tile(S, B, D, budget_bytes=2 * 1024 * 1024):
    """Largest batch tile TB that is a multiple of 8, divides B, and keeps one
    (S, TB, D) f32 block under `budget_bytes` (the pipeline double-buffers
    it).  Falls back to the whole batch when B is small / not 8-divisible."""
    if B % 8 != 0:
        return B
    best = 8
    tb = 8
    while tb <= B:
        if B % tb == 0 and S * tb * D * 4 <= budget_bytes:
            best = tb
        tb += 8
    return best


def simple_attention(M, w_scalar, x=None, *, tb=None):
    """M: (seq_len, batch, input_dim); w_scalar: (1, input_dim) Linear weight.

    Returns (attn_pool (B, D), alpha (B, 1, S)), matching the torch module.
    """
    del x  # dummy argument (MatchingAttention compatibility), unused
    M = M.astype(jnp.float32)
    w_scalar = w_scalar.astype(jnp.float32)
    S, B, D = M.shape
    if tb is None:
        tb = _pick_batch_tile(S, B, D)
    assert B % tb == 0, (B, tb)

    pool, alpha = pl.pallas_call(
        _simple_attention_kernel,
        out_shape=(jax.ShapeDtypeStruct((B, D), jnp.float32),
                   jax.ShapeDtypeStruct((B, 1, S), jnp.float32)),
        grid=(B // tb,),
        in_specs=[pl.BlockSpec((S, tb, D), lambda i: (0, i, 0)),
                  pl.BlockSpec((1, D), lambda i: (0, 0))],
        out_specs=(pl.BlockSpec((tb, D), lambda i: (i, 0)),
                   pl.BlockSpec((tb, 1, S), lambda i: (i, 0, 0))),
        compiler_params=pltpu.CompilerParams(
            dimension_semantics=("parallel",),        # 2-TC sharding on v7x
            vmem_limit_bytes=32 * 1024 * 1024),
    )(M, w_scalar)
    return pool, alpha


# ----------------------------------------------------------------------------
# Pure-JAX reference (for correctness check)
# ----------------------------------------------------------------------------
def reference_forward(M, w_scalar, x=None):
    del x
    hi = jax.lax.Precision.HIGHEST
    scale = jnp.einsum("sbd,od->sbo", M, w_scalar, precision=hi)   # (S, B, 1)
    alpha = jax.nn.softmax(scale, axis=0)                          # (S, B, 1)
    alpha_p = jnp.transpose(alpha, (1, 2, 0))                      # (B, 1, S)
    attn_pool = jnp.einsum("bos,sbd->bod", alpha_p, M, precision=hi)[:, 0, :]
    return attn_pool, alpha_p


if __name__ == "__main__":
    def run_check(S, B, D, tb=None):
        key = jax.random.PRNGKey(0)
        km, kw = jax.random.split(key)
        M = jax.random.normal(km, (S, B, D), jnp.float32)
        # PyTorch nn.Linear default init: U(-1/sqrt(fan_in), 1/sqrt(fan_in))
        bound = 1.0 / math.sqrt(D)
        w_scalar = jax.random.uniform(kw, (1, D), jnp.float32, -bound, bound)

        fwd = jax.jit(simple_attention, static_argnames=("tb",))
        pool, alpha = fwd(M, w_scalar, tb=tb)
        pool = jax.block_until_ready(pool)
        alpha = jax.block_until_ready(alpha)

        ref_pool, ref_alpha = reference_forward(M, w_scalar)
        ref_pool = jax.block_until_ready(ref_pool)
        ref_alpha = jax.block_until_ready(ref_alpha)

        assert pool.shape == (B, D) and pool.dtype == jnp.float32
        assert alpha.shape == (B, 1, S) and alpha.dtype == jnp.float32
        assert jnp.allclose(pool, ref_pool, atol=1e-4, rtol=1e-4), (
            f"attn_pool max abs diff {jnp.max(jnp.abs(pool - ref_pool))}")
        assert jnp.allclose(alpha, ref_alpha, atol=1e-4, rtol=1e-4), (
            f"alpha max abs diff {jnp.max(jnp.abs(alpha - ref_alpha))}")

    # multi-step batch grid (TB = 8, grid = (2,)), lane-dense alpha
    run_check(S=16, B=16, D=128, tb=8)
    # small-batch fallback path (TB == B == 4, single grid step)
    run_check(S=8, B=4, D=128)

    print("KERNEL_OK")
</pallas_src>

<mosaic_0001>
module attributes {stable_mosaic.version = 11 : i64} {
  func.func @_simple_attention_kernel(%arg0: i32, %arg1: memref<16x8x128xf32, #tpu.memory_space<vmem>>, %arg2: memref<1x128xf32, #tpu.memory_space<vmem>>, %arg3: memref<8x128xf32, #tpu.memory_space<vmem>>, %arg4: memref<8x1x16xf32, #tpu.memory_space<vmem>>) attributes {dimension_semantics = [#tpu.dimension_semantics<parallel>], iteration_bounds = array<i64: 2>, scalar_prefetch = 0 : i64, scratch_operands = 0 : i64, tpu.core_type = #tpu.core_type<tc>, window_params = [{transform_indices = @transform_0, window_bounds = array<i64: 16, 8, 128>}, {pipeline_mode = #tpu.pipeline_mode<synchronous>, transform_indices = @transform_1, window_bounds = array<i64: 1, 128>}, {transform_indices = @transform_2, window_bounds = array<i64: 8, 128>}, {transform_indices = @transform_3, window_bounds = array<i64: 8, 1, 16>}]} {
    %c0 = arith.constant 0 : index
    %c0_0 = arith.constant 0 : index
    %c0_1 = arith.constant 0 : index
    %0 = vector.load %arg1[%c0, %c0_0, %c0_1] : memref<16x8x128xf32, #tpu.memory_space<vmem>>, vector<16x8x128xf32>
    %c0_2 = arith.constant 0 : index
    %c0_3 = arith.constant 0 : index
    %1 = vector.load %arg2[%c0_2, %c0_3] : memref<1x128xf32, #tpu.memory_space<vmem>>, vector<1x128xf32>
    %2 = vector.shape_cast %1 : vector<1x128xf32> to vector<1x1x128xf32>
    %3 = vector.broadcast %2 : vector<1x1x128xf32> to vector<16x8x128xf32>
    %4 = arith.mulf %0, %3 : vector<16x8x128xf32>
    %cst = arith.constant dense<0.000000e+00> : vector<16x8xf32>
    %5 = vector.multi_reduction <add>, %4, %cst [2] : vector<16x8x128xf32> to vector<16x8xf32>
    %6 = vector.shape_cast %5 : vector<16x8xf32> to vector<16x8x1xf32>
    %cst_4 = arith.constant dense<0xFF800000> : vector<8x1xf32>
    %7 = vector.multi_reduction <maximumf>, %6, %cst_4 [0] : vector<16x8x1xf32> to vector<8x1xf32>
    %8 = vector.shape_cast %7 : vector<8x1xf32> to vector<1x8x1xf32>
    %9 = vector.broadcast %8 : vector<1x8x1xf32> to vector<16x8x1xf32>
    %10 = arith.subf %6, %9 : vector<16x8x1xf32>
    %11 = math.exp %10 : vector<16x8x1xf32>
    %cst_5 = arith.constant dense<0.000000e+00> : vector<8x1xf32>
    %12 = vector.multi_reduction <add>, %11, %cst_5 [0] : vector<16x8x1xf32> to vector<8x1xf32>
    %13 = vector.shape_cast %12 : vector<8x1xf32> to vector<1x8x1xf32>
    %14 = tpu.reciprocal %13 : vector<1x8x1xf32> -> vector<1x8x1xf32>
    %15 = vector.broadcast %14 : vector<1x8x1xf32> to vector<16x8x1xf32>
    %16 = arith.mulf %11, %15 : vector<16x8x1xf32>
    %17 = vector.broadcast %16 : vector<16x8x1xf32> to vector<16x8x128xf32>
    %18 = arith.mulf %17, %0 : vector<16x8x128xf32>
    %cst_6 = arith.constant dense<0.000000e+00> : vector<8x128xf32>
    %19 = vector.multi_reduction <add>, %18, %cst_6 [0] : vector<16x8x128xf32> to vector<8x128xf32>
    %c0_7 = arith.constant 0 : index
    %c0_8 = arith.constant 0 : index
    %20 = vector.load %arg3[%c0_7, %c0_8] : memref<8x128xf32, #tpu.memory_space<vmem>>, vector<8x128xf32>
    tpu.vector_store %arg3[%c0_7, %c0_8], %19 {strides = array<i32>} : memref<8x128xf32, #tpu.memory_space<vmem>>, vector<8x128xf32>,
    %cst_9 = arith.constant dense<0.000000e+00> : vector<16x8xf32>
    %21 = vector.multi_reduction <add>, %16, %cst_9 [2] : vector<16x8x1xf32> to vector<16x8xf32>
    %22 = tpu.transpose %21, [1, 0] : vector<16x8xf32> -> vector<8x16xf32>
    %c0_10 = arith.constant 0 : index
    %c0_11 = arith.constant 0 : index
    %c0_12 = arith.constant 0 : index
    %23 = vector.load %arg4[%c0_10, %c0_11, %c0_12] : memref<8x1x16xf32, #tpu.memory_space<vmem>>, vector<8x1x16xf32>
    %24 = vector.shape_cast %23 : vector<8x1x16xf32> to vector<8x16xf32>
    %25 = vector.shape_cast %22 : vector<8x16xf32> to vector<8x1x16xf32>
    tpu.vector_store %arg4[%c0_10, %c0_11, %c0_12], %25 {strides = array<i32>} : memref<8x1x16xf32, #tpu.memory_space<vmem>>, vector<8x1x16xf32>,
    return
  }
  func.func @transform_0(%arg0: i32) -> (i32, i32, i32) {
    %c0_i32 = arith.constant 0 : i32
    %c0_i32_0 = arith.constant 0 : i32
    %c0_i32_1 = arith.constant 0 : i32
    return %c0_i32, %arg0, %c0_i32_0 : i32, i32, i32
  }
  func.func @transform_1(%arg0: i32) -> (i32, i32) {
    %c0_i32 = arith.constant 0 : i32
    %c0_i32_0 = arith.constant 0 : i32
    %c0_i32_1 = arith.constant 0 : i32
    return %c0_i32, %c0_i32_0 : i32, i32
  }
  func.func @transform_2(%arg0: i32) -> (i32, i32) {
    %c0_i32 = arith.constant 0 : i32
    %c0_i32_0 = arith.constant 0 : i32
    return %arg0, %c0_i32 : i32, i32
  }
  func.func @transform_3(%arg0: i32) -> (i32, i32, i32) {
    %c0_i32 = arith.constant 0 : i32
    %c0_i32_0 = arith.constant 0 : i32
    %c0_i32_1 = arith.constant 0 : i32
    return %arg0, %c0_i32, %c0_i32_0 : i32, i32, i32
  }
}

</mosaic_0001>

<bundles_post_ra>
// kernel: simple_attention.1
= control target key start
LH: loop header
LB: loop body
LE: loop exit
PB: predicated region body
PF: predicated region fallthrough
CT: control target
= control target key end

     0   :  { %9 = vsyncpa [#allocation3], 0  ;;  %s1375_s0 = inlined_call_operand.hbm [shape: f32[16,16,128], index: 0, kind: input, shape index: {}]   ;;  %s1376_s1 = inlined_call_operand.vmem [shape: f32[1,128], index: 1, kind: input, shape index: {}]   ;;  %s1377_s2 = inlined_call_operand.hbm [shape: f32[16,128], index: 2, kind: output, shape index: {0}]   ;;  %s1378_s3 = inlined_call_operand.hbm [shape: f32[16,1,16], index: 3, kind: output, shape index: {1}]  }
   0x1   :  { %11 = vsyncpa [#allocation3 + $0x1], 0 }
   0x2   :  { %12 = vsyncpa [#allocation4], 0 }
   0x3   :  { %14 = vsyncpa [#allocation4 + $0x1], 0 }
   0x4   :  { %15 = vsyncpa [#allocation7], 0 }
   0x5   :  { %17 = vsyncpa [#allocation7 + $0x1], 0  ;;  %s1024_s12 = smov 0   ;;  %s1026_s13 = smov 0  }
   0x6   :  { %s1028_s14 = smov 0   ;;  %s1030_s15 = smov 0  }
   0x7 LB: > { %s1045_s16 = sadd.s32 4294967295, %s993_s15   ;;  %s755_s17 = sadd.s32 4294967294, %s993_s15   ;;  %s993_s15 = sphi %s1030_s15, %s1392_s15   ;;  %s989_s14 = sphi %s1028_s14, %s1391_s14   ;;  %s985_s13 = sphi %s1026_s13, %s1390_s13   ;;  %s981_s12 = sphi %s1024_s12, %s1389_s12  }
   0x8   : > { %s1049_s18 = sadd.s32 1, %s993_s15   ;;  %s30_s19 = sadd.s32 1, %s989_s14 }
   0x9   : > { %s27_s20 = ssub.s32 %s993_s15, %s1049_s18  ;;  %p37_p0 = scmp.ne.s32.totalorder %s989_s14, %s985_s13 }
   0xa   : > { %p28_p1 = scmp.eq.s32.totalorder %s27_s20, 0  ;;  %p38_p2 = scmp.eq.s32.totalorder %s993_s15, 0 }
   0xb   : > { %p43_p3 = scmp.ne.s32.totalorder %s985_s13, %s981_s12  ;;  %p44_p4 = scmp.eq.s32.totalorder %s1045_s16, 0 }
   0xc   : > { %s1061_s21 = scalar_select %p28_p1, %s989_s14, %s30_s19  }
   0xd   : > { %p1063_p5 = por %p38_p2, %p37_p0  ;;  %p1067_p6 = por %p44_p4, %p43_p3 }
   0xe   : > { %p88_p7 = scmp.eq.s32.totalorder %s1045_s16, 1  ;;  %p94_p8 = scmp.eq.s32.totalorder %s755_s17, 1 }
   0xf   : > { %p790_p10 = scmp.lt.s32.totalorder %s993_s15, 2  ;;  %s143_s26 = sand.u32 1, %s989_s14  }
  0x10   : > { %p1074_p11 = por %p88_p7, %p37_p0  ;;  %p1078_p12 = por %p94_p8, %p43_p3 }
  0x11   : > { %s759_s27 = sshll.u32 %s993_s15, 7  ;;  %s758_s28 = sshll.u32 %s143_s26, 7 }
  0x12   : > { %s1382_s24 = scalar_select %p1074_p11, 1, 0 }
  0x13   : > { %s1383_s25 = scalar_select %p1078_p12, 1, 0 }
  0x14   : > { %s1087_s4 = scalar_lea.hbm %s1375_s0, %s759_s27  ;;  %s147_s5 = scalar_lea.vmem [#allocation2], %s758_s28 }
  0x15   : > { %s153_s6 = sshll.u32 %s147_s5, 4  ;;  %p1091_p13 = pnand %p790_p10, %p1063_p5  ;;  %s1095_s6 = int_to_ptr.vmem [resolvable:$true] %s153_s6 }
  0x16   : > { %s1098_s8 = scalar_lea.sflag [#allocation3], %s143_s26  ;;  %s865_s9 = scalar_lea.hbm %s1087_s4, 2048 }
  0x17   : > { %p866_p1 = scmp.ne.s32.totalorder %s1087_s4, %s865_s9  ;;  %p867_p2 = pneg %p1091_p13 }
  0x18   : > { %s870_s17 = scalar_lea.hbm %s1375_s0, 4096  ;;  %p871_p5 = scmp.lt.u32.totalorder %s1087_s4, %s1375_s0 }
  0x19   : > { %p868_p3 = pnand %p867_p2, %p866_p1  ;;  %p872_p7 = scmp.lt.u32.totalorder %s870_s17, %s865_s9 }
  0x1a   : > { %p874_p10 = scmp.lt.u32.totalorder %s865_s9, %s1087_s4 }
  0x1b   : > { %p869_p4 = pneg %p868_p3  ;;  %p873_p8 = por %p872_p7, %p871_p5 }
  0x1d   : > { %p875_p9 = por %p874_p10, %p873_p8 }
  0x1f   : > { %p876_p0 = pnand %p875_p9, %p869_p4 }
  0x21   : > { %879 = shalt.err (!%p876_p0)
}
  0x22   : > { %s880_s22 = scalar_lea.vmem %s1095_s6, 2048  ;;  %s995_s26 = smov [#allocation2]  }
  0x23   : > { %p881_p1 = scmp.ne.s32.totalorder %s1095_s6, %s880_s22  ;;  %s885_s27 = sshll.u32 %s995_s26, 4  ;;  %s886_s27 = int_to_ptr.vmem [resolvable:$false] %s885_s27 }
  0x24   : > { %s887_s28 = scalar_lea.vmem %s886_s27, 4096  ;;  %p888_p11 = scmp.lt.s32.totalorder %s1095_s6, %s886_s27 }
  0x25   : > { %p883_p3 = pnand %p881_p1, %p867_p2  ;;  %p889_p5 = scmp.lt.s32.totalorder %s887_s28, %s880_s22 }
  0x27   : > { %p884_p12 = pneg %p883_p3  ;;  %p890_p7 = por %p889_p5, %p888_p11 }
  0x29   : > { %p891_p8 = pnand %p890_p7, %p884_p12 }
  0x2b   : > { %894 = shalt.err (!%p891_p8)
}
  0x2c   : > { %s996_s29 = smov 256   ;;  %s997_s30 = smov 128  }
  0x2d   : > { %s998_s5 = smov 8   ;;  %p161_p9 = scmp.lt.s32.totalorder %s993_s15, 3 }
  0x2e   : > { %782 = dma.hbm_to_vmem [thread:$0]  (!%p1091_p13), %s1087_s4, 2048, %s1095_s6, %s1098_s8, %s996_s29, %s997_s30, %s998_s5  }
  0x2f   : > { %p1385_p0 = scmp.ge.s32.totalorder %s993_s15, 1 }
  0x31   : > { %p162_p2 = pnand %p1385_p0, %p161_p9 }
  0x32   : > { %s1130_s9 = sand.u32 (!%p162_p2), 1, %s985_s13  }
  0x33   : > { %165 = sbr.rel (%p162_p2) target bundleno = 463 (0x1cf), region = 28  ;;  %s761_s10 = sshll.u32 (!%p162_p2), %s1130_s9, 7 }
  0x34   : > { %s168_s11 = scalar_lea.sflag (!%p162_p2), [#allocation3], %s1130_s9  ;;  %s1134_s17 = scalar_lea.vmem (!%p162_p2), [#allocation2], %s761_s10 }
  0x3a   : > { %968 = dma.done.wait (%p1067_p6), %s168_s11, 2048  }
  0x3b   : > { %970 = vsyncadd (%p1067_p6), %s168_s11, 4294965248  ;;  %v1141_v0 = vld [vmem:[%s1134_s17 + $0x10] sm:$0xff]  ;;  %v764_v1 = vld [vmem:[%s1376_s1] ss:$0 sm:$0xff]  ;;  %vm496_vm0 = vcmask 1041409   ;;  %vm498_vm1 = vcmask 1042434  }
  0x3c   : > { %v1147_v2 = vld [vmem:[%s1134_s17] sm:$0xff]  ;;  %v225_v3 = vmul.f32 %v764_v1, %v1141_v0  ;;  %v1152_v5 = vld [vmem:[%s1134_s17 + $0x18] sm:$0xff]  ;;  %v1155_v6 = vld [vmem:[%s1134_s17 + $0x8] sm:$0xff]  ;;  %vm500_vm2 = vcmask 1043459   ;;  %vm502_vm3 = vcmask 1044484   ;;  %vm504_vm4 = vcmask 1045509  }
  0x3d   : > { %v223_v4 = vmul.f32 %v764_v1, %v1147_v2  ;;  %v226_v7 = vmul.f32 %v764_v1, %v1152_v5  ;;  %v224_v8 = vmul.f32 %v764_v1, %v1155_v6  ;;  %v1160_v9 = vld [vmem:[%s1134_s17 + $0x28] sm:$0xff]  ;;  %v1163_v10 = vld [vmem:[%s1134_s17 + $0x20] sm:$0xff]  ;;  %v1168_v13 = vld [vmem:[%s1134_s17 + $0x38] sm:$0xff]  ;;  %vm506_vm5 = vcmask 1046534   ;;  %s762_s23 = sshll.u32 %s1130_s9, 3  ;;  %s767_s7 = sshll.u32 %s1045_s16, 7 }
  0x3e   : > { %243 = vadd.xlane.f32.xlu1 %v225_v3  ;;  %v228_v11 = vmul.f32 %v764_v1, %v1160_v9  ;;  %v227_v12 = vmul.f32 %v764_v1, %v1163_v10  ;;  %v1171_v14 = vld [vmem:[%s1134_s17 + $0x30] sm:$0xff]  ;;  %v230_v15 = vmul.f32 %v764_v1, %v1168_v13  ;;  %v1176_v17 = vld [vmem:[%s1134_s17 + $0x48] sm:$0xff]  ;;  %v1179_v18 = vld [vmem:[%s1134_s17 + $0x40] sm:$0xff]  ;;  %vm508_vm6 = vcmask 1047559   ;;  %s191_s8 = scalar_lea.vmem [#allocation5], %s762_s23  ;;  %s1287_s26 = scalar_lea.hbm %s1377_s2, %s767_s7 }
  0x3f   : > { %239 = vadd.xlane.f32.xlu0 %v223_v4  ;;  %v229_v16 = vmul.f32 %v764_v1, %v1171_v14  ;;  %v232_v19 = vmul.f32 %v764_v1, %v1176_v17  ;;  %v231_v20 = vmul.f32 %v764_v1, %v1179_v18  ;;  %v1184_v21 = vld [vmem:[%s1134_s17 + $0x58] sm:$0xff]  ;;  %v1187_v22 = vld [vmem:[%s1134_s17 + $0x50] sm:$0xff]  ;;  %v1192_v25 = vld [vmem:[%s1134_s17 + $0x68] sm:$0xff]  ;;  %s637_s19 = sshll.u32 %s191_s8, 4  ;;  %s619_s27 = scalar_lea.sflag [#allocation4], %s1130_s9  ;;  %s1289_s19 = int_to_ptr.vmem [resolvable:$true] %s637_s19 }
  0x40   : > { %v234_v23 = vmul.f32 %v764_v1, %v1184_v21  ;;  %v233_v24 = vmul.f32 %v764_v1, %v1187_v22  ;;  %v1195_v26 = vld [vmem:[%s1134_s17 + $0x60] sm:$0xff]  ;;  %v236_v27 = vmul.f32 %v764_v1, %v1192_v25  ;;  %v1200_v29 = vld [vmem:[%s1134_s17 + $0x78] sm:$0xff]  ;;  %v1203_v30 = vld [vmem:[%s1134_s17 + $0x70] sm:$0xff]  ;;  %s895_s28 = scalar_lea.vmem %s1289_s19, 128  ;;  %p1386_p11 = scmp.ne.s32.totalorder %s1382_s24, 0 }
  0x41   : > { %v235_v28 = vmul.f32 %v764_v1, %v1195_v26  ;;  %v238_v31 = vmul.f32 %v764_v1, %v1200_v29  ;;  %v237_v32 = vmul.f32 %v764_v1, %v1203_v30  ;;  %p896_p6 = scmp.ne.s32.totalorder %s1289_s19, %s895_s28  ;;  %s999_s29 = smov [#allocation5]  }
  0x42   : > { %245 = vadd.xlane.f32.xlu1 %v226_v7  ;;  %s899_s30 = sshll.u32 %s999_s29, 4  ;;  %s900_s30 = int_to_ptr.vmem [resolvable:$false] %s899_s30 }
  0x43   : > { %241 = vadd.xlane.f32.xlu0 %v224_v8  ;;  %p897_p12 = pnand %p896_p6, %p1386_p11  ;;  %s901_s5 = scalar_lea.vmem %s900_s30, 256 }
  0x44   : > { %p902_p4 = scmp.lt.s32.totalorder %s1289_s19, %s900_s30  ;;  %p903_p10 = scmp.lt.s32.totalorder %s901_s5, %s895_s28 }
  0x45   : > { %p898_p13 = pneg %p897_p12 }
  0x46   : > { %249 = vadd.xlane.f32.xlu1 %v228_v11  ;;  %p904_p1 = por %p903_p10, %p902_p4 }
  0x47   : > { %247 = vadd.xlane.f32.xlu0 %v227_v12 }
  0x48   : > { %p905_p3 = pnand %p904_p1, %p898_p13 }
  0x4a   : > { %253 = vadd.xlane.f32.xlu1 %v230_v15 }
  0x4b   : > { %251 = vadd.xlane.f32.xlu0 %v229_v16 }
  0x4e   : > { %257 = vadd.xlane.f32.xlu1 %v232_v19 }
  0x4f   : > { %255 = vadd.xlane.f32.xlu0 %v231_v20 }
  0x52   : > { %261 = vadd.xlane.f32.xlu1 %v234_v23 }
  0x53   : > { %259 = vadd.xlane.f32.xlu0 %v233_v24 }
  0x56   : > { %265 = vadd.xlane.f32.xlu1 %v236_v27 }
  0x57   : > { %263 = vadd.xlane.f32.xlu0 %v235_v28 }
  0x5a   : > { %269 = vadd.xlane.f32.xlu1 %v238_v31 }
  0x5b   : > { %267 = vadd.xlane.f32.xlu0 %v237_v32 }
  0xcb   : > { %v244_v33 = vpop.xlane.xlu1 %243 }
  0xcc   : > { %v240_v34 = vpop.xlane.xlu0 %239 }
  0xcf   : > { %v246_v35 = vpop.xlane.xlu1 %245 }
  0xd0   : > { %v242_v36 = vpop.xlane.xlu0 %241 }
  0xd3   : > { %v250_v37 = vpop.xlane.xlu1 %249 }
  0xd4   : > { %v248_v38 = vpop.xlane.xlu0 %247  ;;  %v272_v45 = vmax.f32 %v242_v36, %v250_v37 }
  0xd5   : > { %v271_v46 = vmax.f32 %v240_v34, %v248_v38 }
  0xd7   : > { %v254_v39 = vpop.xlane.xlu1 %253 }
  0xd8   : > { %v252_v40 = vpop.xlane.xlu0 %251  ;;  %v274_v49 = vmax.f32 %v246_v35, %v254_v39 }
  0xd9   : > { %v273_v50 = vmax.f32 %v244_v33, %v252_v40 }
  0xdb   : > { %v258_v41 = vpop.xlane.xlu1 %257 }
  0xdc   : > { %v256_v42 = vpop.xlane.xlu0 %255  ;;  %v276_v51 = vmax.f32 %v272_v45, %v258_v41 }
  0xdd   : > { %v275_v52 = vmax.f32 %v271_v46, %v256_v42 }
  0xdf   : > { %v1207_v43 = vpop.xlane.xlu1 %261 }
  0xe0   : > { %v260_v44 = vpop.xlane.xlu0 %259  ;;  %v278_v53 = vmax.f32 %v274_v49, %v1207_v43 }
  0xe1   : > { %v277_v54 = vmax.f32 %v273_v50, %v260_v44 }
  0xe3   : > { %v1209_v47 = vpop.xlane.xlu1 %265 }
  0xe4   : > { %v1211_v48 = vpop.xlane.xlu0 %263  ;;  %v280_v55 = vmax.f32 %v276_v51, %v1209_v47 }
  0xe5   : > { %v279_v56 = vmax.f32 %v275_v52, %v1211_v48 }
  0xe7   : > { %v1216_v57 = vpop.xlane.xlu1 %269  ;;  %v283_v61 = vmax.f32 %v279_v56, %v280_v55 }
  0xe8   : > { %v1218_v58 = vpop.xlane.xlu0 %267  ;;  %v282_v59 = vmax.f32 %v278_v53, %v1216_v57 }
  0xe9   : > { %v281_v60 = vmax.f32 %v277_v54, %v1218_v58 }
  0xeb   : > { %v284_v62 = vmax.f32 %v281_v60, %v282_v59 }
  0xed   : > { %v285_v63 = vmax.f32 %v283_v61, %v284_v62 }
  0xef   : > { %v286_v1 = vsub.f32 %v240_v34, %v285_v63  ;;  %v287_v3 = vsub.f32 %v242_v36, %v285_v63  ;;  %v288_v4 = vsub.f32 %v244_v33, %v285_v63  ;;  %v289_v7 = vsub.f32 %v246_v35, %v285_v63 }
  0xf0   : > { %v290_v12 = vsub.f32 %v248_v38, %v285_v63  ;;  %v291_v16 = vsub.f32 %v250_v37, %v285_v63  ;;  %v292_v20 = vsub.f32 %v252_v40, %v285_v63  ;;  %v293_v24 = vsub.f32 %v254_v39, %v285_v63 }
  0xf1   : > { %v302_v8 = vmul.f32 1.442695, %v286_v1  ;;  %v304_v11 = vmul.f32 1.442695, %v287_v3  ;;  %v306_v15 = vmul.f32 1.442695, %v288_v4  ;;  %v294_v28 = vsub.f32 %v256_v42, %v285_v63 }
  0xf2   : > { %v308_v19 = vmul.f32 1.442695, %v289_v7  ;;  %v310_v23 = vmul.f32 1.442695, %v290_v12  ;;  %v312_v27 = vmul.f32 1.442695, %v291_v16  ;;  %v295_v32 = vsub.f32 %v258_v41, %v285_v63 }
  0xf3   : > { %831 = vpow2.f32 %v302_v8  ;;  %v314_v31 = vmul.f32 1.442695, %v292_v20  ;;  %v316_v33 = vmul.f32 1.442695, %v293_v24  ;;  %v296_v36 = vsub.f32 %v260_v44, %v285_v63 }
  0xf4   : > { %833 = vpow2.f32 %v304_v11  ;;  %v318_v38 = vmul.f32 1.442695, %v294_v28  ;;  %v297_v40 = vsub.f32 %v1207_v43, %v285_v63  ;;  %v320_v46 = vmul.f32 1.442695, %v295_v32 }
  0xf5   : > { %835 = vpow2.f32 %v306_v15  ;;  %v298_v42 = vsub.f32 %v1211_v48, %v285_v63  ;;  %v322_v50 = vmul.f32 1.442695, %v296_v36  ;;  %v299_v52 = vsub.f32 %v1209_v47, %v285_v63 }
  0xf6   : > { %837 = vpow2.f32 %v308_v19  ;;  %v324_v44 = vmul.f32 1.442695, %v297_v40  ;;  %v300_v55 = vsub.f32 %v1218_v58, %v285_v63  ;;  %v301_v60 = vsub.f32 %v1216_v57, %v285_v63 }
  0xf7   : > { %839 = vpow2.f32 %v310_v23  ;;  %v326_v43 = vmul.f32 1.442695, %v298_v42  ;;  %v328_v48 = vmul.f32 1.442695, %v299_v52 }
  0xf8   : > { %841 = vpow2.f32 %v312_v27  ;;  %v330_v1 = vmul.f32 1.442695, %v300_v55  ;;  %v332_v4 = vmul.f32 1.442695, %v301_v60 }
  0xf9   : > { %843 = vpow2.f32 %v314_v31  ;;  %v430_v31 = vlaneseq }
  0xfa   : > { %845 = vpow2.f32 %v316_v33 }
  0xfb   : > { %847 = vpow2.f32 %v318_v38  ;;  %v431_v32 = vand.u32 127, %v430_v31  ;;  %v1227_v33 = vshrl.u32 %v430_v31, 7 }
  0xfc   : > { %849 = vpow2.f32 %v320_v46 }
  0xfd   : > { %v832_v34 = vpop.eup %831  ;;  %851 = vpow2.f32 %v322_v50  ;;  %v1230_v46 = vsub.s32 %v431_v32, %v1227_v33 }
  0xfe   : > { %v834_v35 = vpop.eup %833  ;;  %853 = vpow2.f32 %v324_v44 }
  0xff   : > { %v334_v37 = vadd.f32 %v834_v35, %v832_v34  ;;  %v836_v45 = vpop.eup %835  ;;  %855 = vpow2.f32 %v326_v43 }
 0x100   : > { %v838_v49 = vpop.eup %837  ;;  %857 = vpow2.f32 %v328_v48 }
 0x101   : > { %v335_v39 = vadd.f32 %v836_v45, %v334_v37  ;;  %v840_v51 = vpop.eup %839  ;;  %859 = vpow2.f32 %v330_v1 }
 0x102   : > { %v842_v54 = vpop.eup %841  ;;  %861 = vpow2.f32 %v332_v4 }
 0x103   : > { %v336_v41 = vadd.f32 %v838_v49, %v335_v39  ;;  %v844_v59 = vpop.eup %843 }
 0x104   : > { %v846_v62 = vpop.eup %845 }
 0x105   : > { %v337_v53 = vadd.f32 %v840_v51, %v336_v41  ;;  %v848_v47 = vpop.eup %847 }
 0x106   : > { %v850_v8 = vpop.eup %849 }
 0x107   : > { %v338_v56 = vadd.f32 %v842_v54, %v337_v53  ;;  %v852_v11 = vpop.eup %851 }
 0x108   : > { %v854_v15 = vpop.eup %853 }
 0x109   : > { %v339_v61 = vadd.f32 %v844_v59, %v338_v56  ;;  %v856_v57 = vpop.eup %855 }
 0x10a   : > { %v858_v19 = vpop.eup %857 }
 0x10b   : > { %v340_v3 = vadd.f32 %v846_v62, %v339_v61  ;;  %v860_v23 = vpop.eup %859 }
 0x10c   : > { %v862_v27 = vpop.eup %861 }
 0x10d   : > { %v341_v7 = vadd.f32 %v848_v47, %v340_v3 }
 0x10f   : > { %v342_v58 = vadd.f32 %v850_v8, %v341_v7 }
 0x111   : > { %v343_v12 = vadd.f32 %v852_v11, %v342_v58 }
 0x113   : > { %v344_v16 = vadd.f32 %v854_v15, %v343_v12 }
 0x115   : > { %v345_v63 = vadd.f32 %v856_v57, %v344_v16 }
 0x117   : > { %v346_v20 = vadd.f32 %v858_v19, %v345_v63 }
 0x119   : > { %v347_v24 = vadd.f32 %v860_v23, %v346_v20 }
 0x11b   : > { %v348_v28 = vadd.f32 %v862_v27, %v347_v24 }
 0x11d   : > { %863 = vrcp.f32 %v348_v28 }
 0x127   : > { %v864_v36 = vpop.eup %863 }
 0x128   : > { %v350_v38 = vmul.f32 %v864_v36, %v832_v34  ;;  %v351_v37 = vmul.f32 %v864_v36, %v834_v35  ;;  %v352_v40 = vmul.f32 %v864_v36, %v836_v45  ;;  %v353_v39 = vmul.f32 %v864_v36, %v838_v49 }
 0x129   : > { %v354_v42 = vmul.f32 %v864_v36, %v840_v51  ;;  %v355_v50 = vmul.f32 %v864_v36, %v842_v54  ;;  %v356_v45 = vmul.f32 %v864_v36, %v844_v59  ;;  %v357_v44 = vmul.f32 %v864_v36, %v846_v62 }
 0x12a   : > { %v367_v41 = vmul.f32 %v351_v37, %v1155_v6  ;;  %v435_v52 = vrot.slane %v350_v38, %v1230_v46  ;;  %v439_v34 = vrot.slane %v351_v37, %v1230_v46  ;;  %v443_v35 = vrot.slane %v352_v40, %v1230_v46 }
 0x12b   : > { %v358_v53 = vmul.f32 %v864_v36, %v848_v47  ;;  %v359_v49 = vmul.f32 %v864_v36, %v850_v8  ;;  %v447_v55 = vrot.slane %v353_v39, %v1230_v46  ;;  %v366_v54 = vmul.f32 %v350_v38, %v1147_v2 }
 0x12c   : > { %v497_v51 = vsel %vm496_vm0, %v439_v34, %v435_v52  ;;  %v360_v43 = vmul.f32 %v864_v36, %v852_v11  ;;  %v368_v6 = vmul.f32 %v352_v40, %v1141_v0  ;;  %v451_v56 = vrot.slane %v354_v42, %v1230_v46 }
 0x12d   : > { %v499_v60 = vsel %vm498_vm1, %v443_v35, %v497_v51  ;;  %v369_v48 = vmul.f32 %v353_v39, %v1152_v5  ;;  %v455_v59 = vrot.slane %v355_v50, %v1230_v46  ;;  %v382_v62 = vadd.f32 %v367_v41, %v366_v54 }
 0x12e   : > { %v501_v61 = vsel %vm500_vm2, %v447_v55, %v499_v60  ;;  %v459_v1 = vrot.slane %v356_v45, %v1230_v46  ;;  %v467_v3 = vrot.slane %v358_v53, %v1230_v46  ;;  %v361_v47 = vmul.f32 %v864_v36, %v854_v15 }
 0x12f   : > { %v503_v2 = vsel %vm502_vm3, %v451_v56, %v501_v61  ;;  %v463_v0 = vrot.slane %v357_v44, %v1230_v46  ;;  %v383_v7 = vadd.f32 %v382_v62, %v368_v6  ;;  %v362_v8 = vmul.f32 %v864_v36, %v856_v57 }
 0x130   : > { %v505_v4 = vsel %vm504_vm4, %v455_v59, %v503_v2  ;;  %v363_v58 = vmul.f32 %v864_v36, %v858_v19  ;;  %v471_v11 = vrot.slane %v359_v49, %v1230_v46  ;;  %v475_v12 = vrot.slane %v360_v43, %v1230_v46 }
 0x131   : > { %v507_v5 = vsel %vm506_vm5, %v459_v1, %v505_v4  ;;  %v370_v16 = vmul.f32 %v354_v42, %v1163_v10  ;;  %v384_v20 = vadd.f32 %v383_v7, %v369_v48  ;;  %v364_v24 = vmul.f32 %v864_v36, %v860_v23 }
 0x132   : > { %v509_v63 = vsel %vm508_vm6, %v463_v0, %v507_v5  ;;  %v365_v15 = vmul.f32 %v864_v36, %v862_v27  ;;  %v479_v28 = vrot.slane %v361_v47, %v1230_v46  ;;  %v510_v31 = vsel %vm496_vm0, %v471_v11, %v467_v3 }
 0x133   : > { %519 = vxpose.xlu0.b32.start [1/2] (short) (narrow) %v509_v63, 8  ;;  %v371_v57 = vmul.f32 %v355_v50, %v1160_v9  ;;  %v385_v32 = vadd.f32 %v384_v20, %v370_v16  ;;  %v483_v19 = vrot.slane %v362_v8, %v1230_v46  ;;  %v511_v38 = vsel %vm498_vm1, %v475_v12, %v510_v31 }
 0x134   : > { %v487_v37 = vrot.slane %v363_v58, %v1230_v46  ;;  %v512_v10 = vsel %vm500_vm2, %v479_v28, %v511_v38  ;;  %v372_v40 = vmul.f32 %v356_v45, %v1171_v14  ;;  %v491_v27 = vrot.slane %v364_v24, %v1230_v46 }
 0x135   : > { %v386_v23 = vadd.f32 %v385_v32, %v371_v57  ;;  %v513_v36 = vsel %vm502_vm3, %v483_v19, %v512_v10  ;;  %v495_v39 = vrot.slane %v365_v15, %v1230_v46  ;;  %v373_v42 = vmul.f32 %v357_v44, %v1168_v13 }
 0x136   : > { %v514_v9 = vsel %vm504_vm4, %v487_v37, %v513_v36  ;;  %v374_v34 = vmul.f32 %v358_v53, %v1179_v18  ;;  %v375_v35 = vmul.f32 %v359_v49, %v1176_v17  ;;  %v376_v46 = vmul.f32 %v360_v43, %v1187_v22 }
 0x137   : > { %v387_v50 = vadd.f32 %v386_v23, %v372_v40  ;;  %v515_v41 = vsel %vm506_vm5, %v491_v27, %v514_v9  ;;  %v377_v13 = vmul.f32 %v361_v47, %v1184_v21  ;;  %v378_v44 = vmul.f32 %v362_v8, %v1195_v26 }
 0x138   : > { %v516_v52 = vsel %vm508_vm6, %v495_v39, %v515_v41  ;;  %v379_v18 = vmul.f32 %v363_v58, %v1192_v25  ;;  %v380_v6 = vmul.f32 %v364_v24, %v1203_v30  ;;  %v381_v22 = vmul.f32 %v365_v15, %v1200_v29 }
 0x139   : > { %v388_v14 = vadd.f32 %v387_v50, %v373_v42  ;;  %520 = vxpose.xlu0.b32.end [2/2] (short) (narrow) %v516_v52, 8 }
 0x13b   : > { %v389_v45 = vadd.f32 %v388_v14, %v374_v34 }
 0x13d   : > { %v390_v55 = vadd.f32 %v389_v45, %v375_v35 }
 0x13f   : > { %v391_v51 = vadd.f32 %v390_v55, %v376_v46 }
 0x141   : > { %v392_v54 = vadd.f32 %v391_v51, %v377_v13 }
 0x143   : > { %v393_v53 = vadd.f32 %v392_v54, %v378_v44 }
 0x145   : > { %v394_v17 = vadd.f32 %v393_v53, %v379_v18 }
 0x147   : > { %v395_v49 = vadd.f32 %v394_v17, %v380_v6 }
 0x149   : > { %v396_v21 = vadd.f32 %v395_v49, %v381_v22 }
 0x14b   : > { %397 = vst [vmem:[%s191_s8] sm:$0xff] %v396_v21 }
 0x14c   : > { %908 = shalt.err (!%p905_p3)
}
 0x14d   : > { %s909_s10 = scalar_lea.hbm %s1287_s26, 128  ;;  %s913_s4 = scalar_lea.hbm %s1377_s2, 256 }
 0x14e   : > { %p910_p5 = scmp.ne.s32.totalorder %s1287_s26, %s909_s10  ;;  %p914_p9 = scmp.lt.u32.totalorder %s1287_s26, %s1377_s2 }
 0x14f   : > { %p915_p0 = scmp.lt.u32.totalorder %s913_s4, %s909_s10  ;;  %p917_p6 = scmp.lt.u32.totalorder %s909_s10, %s1287_s26 }
 0x150   : > { %p911_p7 = pnand %p910_p5, %p1386_p11 }
 0x151   : > { %p916_p2 = por %p915_p0, %p914_p9 }
 0x152   : > { %p912_p8 = pneg %p911_p7 }
 0x153   : > { %p918_p12 = por %p917_p6, %p916_p2 }
 0x155   : > { %p919_p13 = pnand %p918_p12, %p912_p8 }
 0x157   : > { %922 = shalt.err (!%p919_p13)
}
 0x158   : > { %775 = dma.vmem_to_hbm [thread:$0]  (%p1386_p11), %s1289_s19, 128, %s1287_s26, %s619_s27   ;;  %v1000_v25 = vmov 1966171168   ;;  %vm609_vm7 = vcmask 122880  }
 0x159   : > { %v554_v26 = vunpack.c.l.s4 %v1000_v25  ;;  %s198_s19 = scalar_lea.vmem [#allocation6], %s762_s23  ;;  %s1325_s27 = scalar_lea.hbm %s1378_s3, %s767_s7 }
 0x15a   : > { %s650_s20 = sshll.u32 %s198_s19, 4  ;;  %s624_s16 = scalar_lea.sflag [#allocation7], %s1130_s9  ;;  %s1327_s20 = int_to_ptr.vmem [resolvable:$true] %s650_s20 }
 0x15b   : > { %v555_v29 = vunpack.c.0.s8 %v554_v26  ;;  %s923_s23 = scalar_lea.vmem %s1327_s20, 128  ;;  %s1001_s7 = smov [#allocation6]  }
 0x15c   : > { %p924_p4 = scmp.ne.s32.totalorder %s1327_s20, %s923_s23  ;;  %s927_s28 = sshll.u32 %s1001_s7, 4  ;;  %s928_s28 = int_to_ptr.vmem [resolvable:$false] %s927_s28 }
 0x15d   : > { %v558_v30 = vsub.s32 %v555_v29, %v1227_v33  ;;  %s929_s29 = scalar_lea.vmem %s928_s28, 256  ;;  %p930_p3 = scmp.lt.s32.totalorder %s1327_s20, %s928_s28 }
 0x15e   : > { %p925_p10 = pnand %p924_p4, %p1386_p11  ;;  %p931_p5 = scmp.lt.s32.totalorder %s929_s29, %s923_s23 }
 0x160   : > { %p926_p1 = pneg %p925_p10  ;;  %p932_p7 = por %p931_p5, %p930_p3 }
 0x162   : > { %p933_p8 = pnand %p932_p7, %p926_p1 }
 0x1b5   : > { %v535_v43 = vpop.trf.xlu0 }
 0x1b6   : > { %v552_v56 = vcombine.high %v535_v43, %v535_v43  ;;  %v559_v60 = vrot.slane %v535_v43, %v558_v30 }
 0x1b8   : > { %v566_v48 = vrot.slane %v552_v56, %v558_v30  ;;  %v567_v59 = vcombine.high %v559_v60, %v559_v60  ;;  %v575_v61 = vrot.slane %v559_v60, %v558_v30 }
 0x1ba   : > { %v568_v62 = vcombine.high %v566_v48, %v566_v48  ;;  %v582_v1 = vrot.slane %v566_v48, %v558_v30  ;;  %v589_v3 = vrot.slane %v567_v59, %v558_v30  ;;  %v597_v2 = vcombine.high %v575_v61, %v575_v61  ;;  %610 = vst.msk [vmem:[%s198_s19] sm:$0x1] %vm609_vm7, %v575_v61 }
 0x1bc   : > { %v596_v47 = vrot.slane %v568_v62, %v558_v30  ;;  %v598_v33 = vcombine.high %v582_v1, %v582_v1  ;;  %v599_v0 = vcombine.high %v589_v3, %v589_v3  ;;  %611 = vst.msk [vmem:[%s198_s19 + $0x1] sm:$0x1] %vm609_vm7, %v589_v3  ;;  %612 = vst.msk [vmem:[%s198_s19 + $0x2] sm:$0x1] %vm609_vm7, %v597_v2 }
 0x1bd   : > { %614 = vst.msk [vmem:[%s198_s19 + $0x4] sm:$0x1] %vm609_vm7, %v582_v1 }
 0x1be   : > { %v600_v4 = vcombine.high %v596_v47, %v596_v47  ;;  %613 = vst.msk [vmem:[%s198_s19 + $0x3] sm:$0x1] %vm609_vm7, %v599_v0  ;;  %615 = vst.msk [vmem:[%s198_s19 + $0x5] sm:$0x1] %vm609_vm7, %v596_v47 }
 0x1bf   : > { %616 = vst.msk [vmem:[%s198_s19 + $0x6] sm:$0x1] %vm609_vm7, %v598_v33 }
 0x1c0   : > { %617 = vst.msk [vmem:[%s198_s19 + $0x7] sm:$0x1] %vm609_vm7, %v600_v4 }
 0x1c1   : > { %936 = shalt.err (!%p933_p8)
}
 0x1c2   : > { %s937_s30 = scalar_lea.hbm %s1325_s27, 128  ;;  %s941_s11 = scalar_lea.hbm %s1378_s3, 256 }
 0x1c3   : > { %p938_p9 = scmp.ne.s32.totalorder %s1325_s27, %s937_s30  ;;  %p942_p6 = scmp.lt.u32.totalorder %s1325_s27, %s1378_s3 }
 0x1c4   : > { %p943_p12 = scmp.lt.u32.totalorder %s941_s11, %s937_s30  ;;  %p945_p4 = scmp.lt.u32.totalorder %s937_s30, %s1325_s27 }
 0x1c5   : > { %p939_p0 = pnand %p938_p9, %p1386_p11 }
 0x1c6   : > { %p944_p13 = por %p943_p12, %p942_p6 }
 0x1c7   : > { %p940_p2 = pneg %p939_p0 }
 0x1c8   : > { %p946_p10 = por %p945_p4, %p944_p13 }
 0x1ca   : > { %p947_p1 = pnand %p946_p10, %p940_p2 }
 0x1cc   : > { %950 = shalt.err (!%p947_p1)
}
 0x1cd   : > { %s1002_s6 = smov 16   ;;  %s1003_s8 = smov 1  }
 0x1ce   : > { %776 = dma.vmem_to_hbm [thread:$0]  (%p1386_p11), %s1327_s20, 128, %s1325_s27, %s624_s16, %s1002_s6, %s1002_s6, %s1003_s8  }
 0x1cf PF: > { %s665_s19 = sand.u32 1, %s981_s12   ;;  %p1387_p3 = scmp.ne.s32.totalorder %s1383_s25, 0 }
 0x1d0   : > { %p1388_p5 = scmp.ge.s32.totalorder %s993_s15, 2  ;;  %s666_s22 = scalar_lea.sflag [#allocation4], %s665_s19 }
 0x1d2   : > { %p784_p7 = pnand %p1388_p5, %p1387_p3 }
 0x1d4   : > { %972 = dma.done.wait (!%p784_p7), %s666_s22, 128  }
 0x1d5   : > { %974 = vsyncadd (!%p784_p7), %s666_s22, 4294967168  ;;  %s675_s26 = scalar_lea.sflag [#allocation7], %s665_s19 }
 0x1d6   : > { %976 = dma.done.wait (!%p784_p7), %s675_s26, 128  }
 0x1d7   : > { %978 = vsyncadd (!%p784_p7), %s675_s26, 4294967168  ;;  %p20_p11 = scmp.ge.s32.totalorder %s1049_s18, 4   ;;  %s1389_s12 = smov %s985_s13 }
 0x1d8   : > { %s1390_s13 = smov %s989_s14  ;;  %s1391_s14 = smov %s1061_s21 }
 0x1d9   : > { %s1392_s15 = smov %s1049_s18  ;;  %22 = sbr.rel (!%p20_p11) target bundleno = 7 (0x7), region = 90 }
 0x1e0   :  { %680 = vsyncpa [#allocation3], 1 }
 0x1e1   :  { %682 = vsyncpa [#allocation3 + $0x1], 1 }
 0x1e2   :  { %683 = vsyncpa [#allocation4], 1 }
 0x1e3   :  { %685 = vsyncpa [#allocation4 + $0x1], 1 }
 0x1e4   :  { %686 = vsyncpa [#allocation7], 1 }
 0x1e5   :  { %688 = vsyncpa [#allocation7 + $0x1], 1 }

</bundles_post_ra>
